<compile_context>
chip_gen: v5e
topology: v5e:2x2
jax: 0.10.0
libtpu: 0.0.40
codegen_flags: <defaults>
</compile_context>

<pallas_src>
import jax
import jax.numpy as jnp
from jax.experimental import pallas as pl
from jax.experimental.pallas import tpu as pltpu


def _round_up(x: int, m: int) -> int:
    return ((x + m - 1) // m) * m


def loss_discriminator(d_real, d_fake, *, block_rows: int = 512, cols: int = 512):
    """Pallas TPU implementation of LossDiscriminator.forward."""
    assert d_real.shape == d_fake.shape, "d_real and d_fake must match in shape"
    n = int(d_real.size)
    assert n > 0

    # Lane-dense 2-D slab sizing.
    cols = min(cols, _round_up(n, 128))          # multiple of 128 lanes
    rows = _round_up(max(1, -(-n // cols)), 8)   # multiple of 8 sublanes
    block_rows = min(block_rows, rows)           # stays a multiple of 8
    rows = _round_up(rows, block_rows)
    pad = rows * cols - n

    # Neutral padding: log(1 * (1 - 0)) == 0, so padded elements add nothing.
    r = jnp.pad(d_real.reshape(-1), (0, pad), constant_values=1.0)
    f = jnp.pad(d_fake.reshape(-1), (0, pad), constant_values=0.0)
    # Single stacked input -> one DMA stream / one BlockSpec.
    x = jnp.stack([r.reshape(rows, cols), f.reshape(rows, cols)], axis=0)

    inv_n = 1.0 / float(n)
    grid = (rows // block_rows,)

    def kernel(x_ref, o_ref, acc_ref):
        @pl.when(pl.program_id(0) == 0)
        def _init():
            acc_ref[0, 0] = jnp.float32(0.0)

        # Keep input dtype through the DMA; promote to f32 for the math
        # (v5e has no bf16 VPU/EUP path anyway).
        r_blk = x_ref[0].astype(jnp.float32)
        f_blk = x_ref[1].astype(jnp.float32)
        vals = jnp.log(r_blk * (1.0 - f_blk))    # fused: 1 EUP op per element
        acc_ref[0, 0] += jnp.sum(vals)

        @pl.when(pl.program_id(0) == pl.num_programs(0) - 1)
        def _finalize():
            # Divide by the TRUE element count, not the padded block size.
            o_ref[0, 0] = acc_ref[0, 0] * jnp.float32(inv_n)

    out = pl.pallas_call(
        kernel,
        out_shape=jax.ShapeDtypeStruct((1, 1), jnp.float32),
        grid=grid,
        in_specs=[pl.BlockSpec((2, block_rows, cols), lambda i: (0, i, 0))],
        out_specs=pl.BlockSpec(memory_space=pltpu.SMEM),
        scratch_shapes=[pltpu.SMEM((1, 1), jnp.float32)],
        compiler_params=pltpu.CompilerParams(dimension_semantics=("arbitrary",)),
    )(x)
    return out[0, 0]


if __name__ == "__main__":
    key = jax.random.PRNGKey(0)
    k1, k2, k3, k4 = jax.random.split(key, 4)

    # Small discriminator head: (batch, 1) probabilities (sigmoid of noise).
    batch = 8
    d_real = jax.nn.sigmoid(jax.random.normal(k1, (batch, 1), dtype=jnp.float32))
    d_fake = jax.nn.sigmoid(jax.random.normal(k2, (batch, 1), dtype=jnp.float32))
    loss = loss_discriminator(d_real, d_fake)
    jax.block_until_ready(loss)
    ref = jnp.mean(jnp.log(d_real) + jnp.log(1.0 - d_fake))
    assert jnp.allclose(loss, ref, rtol=1e-5, atol=1e-5), (loss, ref)

    # PatchGAN-style output; small block sizes force a multi-step grid so the
    # accumulator init / finalize path is exercised.
    d_real2 = jax.nn.sigmoid(jax.random.normal(k3, (2, 1, 32, 32), dtype=jnp.float32))
    d_fake2 = jax.nn.sigmoid(jax.random.normal(k4, (2, 1, 32, 32), dtype=jnp.float32))
    loss2 = loss_discriminator(d_real2, d_fake2, block_rows=8, cols=128)
    jax.block_until_ready(loss2)
    ref2 = jnp.mean(jnp.log(d_real2) + jnp.log(1.0 - d_fake2))
    assert jnp.allclose(loss2, ref2, rtol=1e-5, atol=1e-5), (loss2, ref2)

    print("KERNEL_OK")
</pallas_src>

<mosaic_0001>
module attributes {stable_mosaic.version = 11 : i64} {
  func.func @kernel(%arg0: i32, %arg1: memref<2x8x128xf32, #tpu.memory_space<vmem>>, %arg2: memref<1x1xf32, #tpu.memory_space<smem>>, %arg3: memref<1x1xf32, #tpu.memory_space<smem>>) attributes {dimension_semantics = [#tpu.dimension_semantics<arbitrary>], iteration_bounds = array<i64: 1>, scalar_prefetch = 0 : i64, scratch_operands = 1 : i64, tpu.core_type = #tpu.core_type<tc>, window_params = [{transform_indices = @transform_0, window_bounds = array<i64: 2, 8, 128>}, {transform_indices = @transform_1, window_bounds = array<i64: 1, 1>}]} {
    %c0_i32 = arith.constant 0 : i32
    %0 = arith.cmpi eq, %arg0, %c0_i32 : i32
    %1 = arith.extui %0 : i1 to i32
    %c0_i32_0 = arith.constant 0 : i32
    %2 = arith.cmpi ne, %1, %c0_i32_0 : i32
    scf.if %2 {
      %cst_12 = arith.constant 0.000000e+00 : f32
      %c0_13 = arith.constant 0 : index
      %c0_14 = arith.constant 0 : index
      %21 = memref.load %arg3[%c0_13, %c0_14] : memref<1x1xf32, #tpu.memory_space<smem>>
      memref.store %cst_12, %arg3[%c0_13, %c0_14] : memref<1x1xf32, #tpu.memory_space<smem>>
    } else {
    }
    %c0 = arith.constant 0 : index
    %c0_1 = arith.constant 0 : index
    %c0_2 = arith.constant 0 : index
    %3 = vector.load %arg1[%c0, %c0_1, %c0_2] : memref<2x8x128xf32, #tpu.memory_space<vmem>>, vector<1x8x128xf32>
    %4 = vector.shape_cast %3 : vector<1x8x128xf32> to vector<8x128xf32>
    %c1 = arith.constant 1 : index
    %c0_3 = arith.constant 0 : index
    %c0_4 = arith.constant 0 : index
    %5 = vector.load %arg1[%c1, %c0_3, %c0_4] : memref<2x8x128xf32, #tpu.memory_space<vmem>>, vector<1x8x128xf32>
    %6 = vector.shape_cast %5 : vector<1x8x128xf32> to vector<8x128xf32>
    %cst = arith.constant 1.000000e+00 : f32
    %7 = vector.broadcast %cst : f32 to vector<8x128xf32>
    %8 = arith.subf %7, %6 : vector<8x128xf32>
    %9 = arith.mulf %4, %8 : vector<8x128xf32>
    %10 = math.log %9 : vector<8x128xf32>
    %c0_5 = arith.constant 0 : index
    %c0_6 = arith.constant 0 : index
    %11 = memref.load %arg3[%c0_5, %c0_6] : memref<1x1xf32, #tpu.memory_space<smem>>
    %12 = vector.shape_cast %10 : vector<8x128xf32> to vector<1x8x128xf32>
    %cst_7 = arith.constant dense<0.000000e+00> : vector<1xf32>
    %13 = vector.multi_reduction <add>, %12, %cst_7 [1, 2] : vector<1x8x128xf32> to vector<1xf32>
    %14 = vector.shape_cast %13 : vector<1xf32> to vector<1x1x1xf32>
    %15 = vector.extract %14[0, 0, 0] : f32 from vector<1x1x1xf32>
    %16 = arith.addf %11, %15 : f32
    %c0_8 = arith.constant 0 : index
    %c0_9 = arith.constant 0 : index
    %17 = memref.load %arg3[%c0_8, %c0_9] : memref<1x1xf32, #tpu.memory_space<smem>>
    memref.store %16, %arg3[%c0_8, %c0_9] : memref<1x1xf32, #tpu.memory_space<smem>>
    %c0_i32_10 = arith.constant 0 : i32
    %18 = arith.cmpi eq, %arg0, %c0_i32_10 : i32
    %19 = arith.extui %18 : i1 to i32
    %c0_i32_11 = arith.constant 0 : i32
    %20 = arith.cmpi ne, %19, %c0_i32_11 : i32
    scf.if %20 {
      %c0_12 = arith.constant 0 : index
      %c0_13 = arith.constant 0 : index
      %21 = memref.load %arg3[%c0_12, %c0_13] : memref<1x1xf32, #tpu.memory_space<smem>>
      %cst_14 = arith.constant 1.250000e-01 : f32
      %22 = arith.mulf %21, %cst_14 : f32
      %c0_15 = arith.constant 0 : index
      %c0_16 = arith.constant 0 : index
      %23 = memref.load %arg2[%c0_15, %c0_16] : memref<1x1xf32, #tpu.memory_space<smem>>
      memref.store %22, %arg2[%c0_15, %c0_16] : memref<1x1xf32, #tpu.memory_space<smem>>
    } else {
    }
    return
  }
  func.func @transform_0(%arg0: i32) -> (i32, i32, i32) {
    %c0_i32 = arith.constant 0 : i32
    %c0_i32_0 = arith.constant 0 : i32
    %c0_i32_1 = arith.constant 0 : i32
    return %c0_i32, %arg0, %c0_i32_0 : i32, i32, i32
  }
  func.func @transform_1(%arg0: i32) -> (i32, i32) {
    %c0_i32 = arith.constant 0 : i32
    %c0_i32_0 = arith.constant 0 : i32
    %c0_i32_1 = arith.constant 0 : i32
    return %c0_i32, %c0_i32_0 : i32, i32
  }
}

</mosaic_0001>

<bundles_post_ra>
// kernel: tpu_custom_call.1
= control target key start
LH: loop header
LB: loop body
LE: loop exit
PB: predicated region body
PF: predicated region fallthrough
CT: control target
= control target key end

     0   :  { %6 = vsyncpa [#allocation4], 0  ;;  %s142_s0 = inlined_call_operand.hbm [shape: f32[2,8,128], index: 0, kind: input, shape index: {}]   ;;  %s143_s1 = inlined_call_operand.hbm [shape: f32[1,1], index: 1, kind: output, shape index: {}]  }
   0x1   :  { %7 = vsyncpa [#allocation5], 0  ;;  %s12_s8 = sshll.u32 %s142_s0, 4  ;;  %s122_s9 = smov [#allocation3]   ;;  %s13_s8 = int_to_ptr.hbm [resolvable:$true] %s12_s8 }
   0x2   :  { %s14_s10 = sshll.u32 %s122_s9, 4  ;;  %s123_s11 = smov 128   ;;  %s15_s10 = int_to_ptr.vmem [resolvable:$true] %s14_s10 }
   0x3   :  { %s124_s12 = smov 8  }
   0x4   :  { %20 = dma.hbm_to_vmem [thread:$0]  %s13_s8, 256, %s15_s10, [#allocation4], %s123_s11, %s123_s11, %s124_s12  }
   0x5   :  { %118 = dma.done.wait [#allocation4], 256  }
   0x6   :  { %119 = vsyncadd [#allocation4], 4294967040  ;;  %v31_v0 = vld [vmem:[#allocation3] sm:$0xff]  ;;  %v33_v1 = vld [vmem:[#allocation3 + $0x8] sm:$0xff]  ;;  %s63_s14 = sshll.u32 %s143_s1, 4  ;;  %s125_s17 = smov [#allocation6]   ;;  %s64_s14 = int_to_ptr.hbm [resolvable:$true] %s63_s14 }
   0x7   :  { %v34_v2 = vsub.f32 1.0, %v33_v1 }
   0x9   :  { %v35_v3 = vmul.f32 %v34_v2, %v31_v0 }
   0xb   :  { %80 = vlog2.f32 %v35_v3 }
  0x11   :  { %v81_v4 = vpop.eup %80 }
  0x12   :  { %v37_v5 = vmul.f32 0.6931472, %v81_v4 }
  0x14   :  { %39 = vadd.xlane.f32.xlu0 %v37_v5 }
  0x87   :  { %v40_v6 = vpop.xlane.xlu0 %39 }
  0x88   :  { %v41_v7 = vrot.slane %v40_v6, 4 }
  0x8a   :  { %v42_v8 = vadd.f32 %v41_v7, %v40_v6 }
  0x8c   :  { %v43_v9 = vrot.slane %v42_v8, 2 }
  0x8e   :  { %v44_v10 = vadd.f32 %v43_v9, %v42_v8 }
  0x90   :  { %v45_v11 = vrot.slane %v44_v10, 1 }
  0x92   :  { %v46_v12 = vadd.f32 %v45_v11, %v44_v10 }
  0x94   :  { %74 = vpush %v46_v12 }
  0xc5   :  { %s75_s15 = spop %74 }
  0xc6   :  { %s55_s16 = smul.f32 0.125, %s75_s15 }
  0xc8   :  { %57 = sst [smem:[#allocation6]] %s55_s16 }
  0xc9   :  { %66 = dma.smem_to_hbm %s125_s17, 16, %s64_s14, [#allocation5]  }
  0xca   :  { %120 = dma.done.wait [#allocation5], 16  }
  0xcb   :  { %121 = vsyncadd [#allocation5], 4294967280 }
  0xcc   :  { %71 = sfence }
  0xcd   :  { %72 = vsyncpa [#allocation4], 1 }
  0xce   :  { %73 = vsyncpa [#allocation5], 1 }

</bundles_post_ra>
